<compile_context>
chip_gen: v5e
topology: v5e:2x2
jax: 0.10.0
libtpu: 0.0.40
codegen_flags: <defaults>
</compile_context>

<pallas_src>
import functools

import jax
import jax.numpy as jnp
from jax.experimental import pallas as pl
from jax.experimental.pallas import tpu as pltpu

_H1 = 256
_H2 = 128
_BN_EPS = 1e-5
_ACTING_BATCH_MAX = 8                      # <= this -> plain XLA path
_TB_BUCKETS = (16, 32, 64, 128, 256, 512, 1024, 2048)


def _round_up(n, m):
    return ((n + m - 1) // m) * m


def _choose_batch_tile(b, max_tile):
    """Bucketed batch tile: smallest bucket >= ceil(round_up(b,8)/2).

    Guarantees >= 2 grid steps for large batches (v7x megacore sharding) and a
    small fixed set of compiled tile shapes (no per-batch-size recompiles).
    """
    b8 = _round_up(b, 8)
    half = (b8 + 1) // 2
    for tb in _TB_BUCKETS:
        if tb >= half:
            return min(tb, max_tile)
    return max_tile


def _dqn_kernel(x_ref, w1_ref, w2_ref, w3_ref, bias_ref, out_ref, *, a_pad):
    # Merged f32 bias row: [b1' (256) | b2' (128) | b3_padded (a_pad)]
    b1 = bias_ref[:, 0:_H1]                               # (1, 256)
    b2 = bias_ref[:, _H1:_H1 + _H2]                       # (1, 128)
    b3 = bias_ref[:, _H1 + _H2:_H1 + _H2 + a_pad]         # (1, a_pad)

    x = x_ref[...]                                        # (TB, S) bf16

    # fc1 (BN1 pre-folded) -> bias add + relu in f32, cast to bf16 for next MXU pass.
    h1 = jnp.dot(x, w1_ref[...], preferred_element_type=jnp.float32) + b1
    h1 = jnp.maximum(h1, 0.0).astype(jnp.bfloat16)
    # Dropout(p=0.5) is identity in eval mode.

    # fc2 (BN2 pre-folded) -> relu
    h2 = jnp.dot(h1, w2_ref[...], preferred_element_type=jnp.float32) + b2
    h2 = jnp.maximum(h2, 0.0).astype(jnp.bfloat16)

    # fc3 (output padded to lane-dense a_pad columns)
    out = jnp.dot(h2, w3_ref[...], preferred_element_type=jnp.float32) + b3
    out_ref[...] = out.astype(out_ref.dtype)


def prepare_params(params):
    """One-time prep: fold eval-mode BN into weights/biases, pad/merge, cast bf16."""
    s1 = params["bn1_gamma"] / jnp.sqrt(params["bn1_var"] + _BN_EPS)
    t1 = params["bn1_beta"] - params["bn1_mean"] * s1
    s2 = params["bn2_gamma"] / jnp.sqrt(params["bn2_var"] + _BN_EPS)
    t2 = params["bn2_beta"] - params["bn2_mean"] * s2

    w1f = (params["w1"] * s1[None, :]).astype(jnp.bfloat16)      # (S, 256)
    b1f = (params["b1"] * s1 + t1).astype(jnp.float32)           # (256,)
    w2f = (params["w2"] * s2[None, :]).astype(jnp.bfloat16)      # (256, 128)
    b2f = (params["b2"] * s2 + t2).astype(jnp.float32)           # (128,)

    a = params["w3"].shape[1]
    a_pad = _round_up(max(a, 1), 128)                            # lane-dense output
    w3p = jnp.zeros((_H2, a_pad), jnp.float32).at[:, :a].set(
        params["w3"].astype(jnp.float32)).astype(jnp.bfloat16)
    b3p = jnp.zeros((a_pad,), jnp.float32).at[:a].set(
        params["b3"].astype(jnp.float32))

    bias = jnp.concatenate([b1f, b2f, b3p]).reshape(1, -1)       # (1, 384 + a_pad) f32

    return {
        "w1": w1f, "w2": w2f, "w3": w3p, "bias": bias,
        "state_size": int(params["w1"].shape[0]),
        "action_size": int(a), "a_pad": int(a_pad),
    }


def _xla_forward(x, prep):
    """Fused XLA path for tiny acting batches (avoids Mosaic launch latency)."""
    b = prep["bias"][0]
    b1, b2, b3 = b[:_H1], b[_H1:_H1 + _H2], b[_H1 + _H2:]
    xb = x.astype(jnp.bfloat16)
    h1 = jnp.dot(xb, prep["w1"], preferred_element_type=jnp.float32) + b1
    h1 = jnp.maximum(h1, 0.0).astype(jnp.bfloat16)
    h2 = jnp.dot(h1, prep["w2"], preferred_element_type=jnp.float32) + b2
    h2 = jnp.maximum(h2, 0.0).astype(jnp.bfloat16)
    out = jnp.dot(h2, prep["w3"], preferred_element_type=jnp.float32) + b3
    return out[:, :prep["action_size"]]


def enhanced_dqn_5m_forward(x, prep, *, max_batch_tile=2048):
    """x: (B, state_size) or (state_size,) float32. prep: from prepare_params()."""
    if x.ndim == 1:                      # mirror torch's `if x.dim() == 1`
        x = x[None, :]
    x = x.astype(jnp.float32)
    B, S = x.shape
    A, a_pad = prep["action_size"], prep["a_pad"]

    # Acting path: launch/DMA-latency bound -> plain fused XLA chain.
    if B <= _ACTING_BATCH_MAX:
        return _xla_forward(x, prep)

    xb = x.astype(jnp.bfloat16)          # halves x DMA; MXU accumulates in f32

    tb = _choose_batch_tile(B, max_batch_tile)
    b_pad = _round_up(B, tb)
    if b_pad != B:
        xb = jnp.pad(xb, ((0, b_pad - B), (0, 0)))

    n_bias = _H1 + _H2 + a_pad
    flops = 2 * b_pad * (S * _H1 + _H1 * _H2 + _H2 * a_pad)
    bytes_accessed = (b_pad * S * 2 + S * _H1 * 2 + _H1 * _H2 * 2
                      + _H2 * a_pad * 2 + n_bias * 4 + b_pad * a_pad * 4)

    out = pl.pallas_call(
        functools.partial(_dqn_kernel, a_pad=a_pad),
        out_shape=jax.ShapeDtypeStruct((b_pad, a_pad), jnp.float32),
        grid=(b_pad // tb,),
        in_specs=[
            pl.BlockSpec((tb, S), lambda i: (i, 0)),                 # x tile (bf16)
            pl.BlockSpec((S, _H1), lambda i: (0, 0)),                # w1 (BN-folded, bf16)
            pl.BlockSpec((_H1, _H2), lambda i: (0, 0)),              # w2 (BN-folded, bf16)
            pl.BlockSpec((_H2, a_pad), lambda i: (0, 0)),            # w3 (padded, bf16)
            pl.BlockSpec((1, n_bias), lambda i: (0, 0)),             # merged f32 biases
        ],
        out_specs=pl.BlockSpec((tb, a_pad), lambda i: (i, 0)),
        compiler_params=pltpu.CompilerParams(
            dimension_semantics=("parallel",)),   # megacore-shard batch on v7x
        cost_estimate=pl.CostEstimate(
            flops=flops, transcendentals=0, bytes_accessed=bytes_accessed),
    )(xb, prep["w1"], prep["w2"], prep["w3"], prep["bias"])

    return out[:B, :A]


def init_params(key, state_size, action_size):
    ks = jax.random.split(key, 12)

    def lin(kw, kb, fan_in, fan_out):
        bound = 1.0 / jnp.sqrt(fan_in)
        w = jax.random.uniform(kw, (fan_in, fan_out), jnp.float32, -bound, bound)
        b = jax.random.uniform(kb, (fan_out,), jnp.float32, -bound, bound)
        return w, b

    w1, b1 = lin(ks[0], ks[1], state_size, 256)
    w2, b2 = lin(ks[2], ks[3], 256, 128)
    w3, b3 = lin(ks[4], ks[5], 128, action_size)
    return {
        "w1": w1, "b1": b1,
        "bn1_gamma": jax.random.uniform(ks[6], (256,), jnp.float32, 0.5, 1.5),
        "bn1_beta": jax.random.normal(ks[7], (256,)) * 0.1,
        "bn1_mean": jax.random.normal(ks[8], (256,)) * 0.1,
        "bn1_var": jax.random.uniform(ks[9], (256,), jnp.float32, 0.5, 1.5),
        "w2": w2, "b2": b2,
        "bn2_gamma": jax.random.uniform(ks[10], (128,), jnp.float32, 0.5, 1.5),
        "bn2_beta": jax.random.normal(ks[11], (128,)) * 0.1,
        "bn2_mean": jnp.zeros((128,), jnp.float32),
        "bn2_var": jnp.ones((128,), jnp.float32),
        "w3": w3, "b3": b3,
    }


def _reference(x, params):
    """Pure-JAX f32 reference for the same eval-mode forward."""
    eps = _BN_EPS
    h = x @ params["w1"] + params["b1"]
    h = (h - params["bn1_mean"]) / jnp.sqrt(params["bn1_var"] + eps)
    h = h * params["bn1_gamma"] + params["bn1_beta"]
    h = jnp.maximum(h, 0.0)
    h = h @ params["w2"] + params["b2"]
    h = (h - params["bn2_mean"]) / jnp.sqrt(params["bn2_var"] + eps)
    h = h * params["bn2_gamma"] + params["bn2_beta"]
    h = jnp.maximum(h, 0.0)
    return h @ params["w3"] + params["b3"]


if __name__ == "__main__":
    key = jax.random.PRNGKey(0)
    state_size, action_size = 16, 4

    kp, kx1, kx2, kx3 = jax.random.split(key, 4)
    params = init_params(kp, state_size, action_size)
    prep = prepare_params(params)

    # bf16 operands vs f32 reference -> loosened tolerance (review item).
    TOL = dict(atol=3e-2, rtol=3e-2)

    # 1-D observation (mirrors torch `x.dim() == 1` unsqueeze) -> XLA acting path.
    x_1d = jax.random.normal(kx1, (state_size,), jnp.float32)
    out_1d = jax.block_until_ready(enhanced_dqn_5m_forward(x_1d, prep))
    assert out_1d.shape == (1, action_size)
    assert jnp.allclose(out_1d, _reference(x_1d[None, :], params), **TOL), \
        "1-D input mismatch vs reference"

    # Small acting-style batch (XLA fallback path, B <= 8).
    x_small = jax.random.normal(kx1, (8, state_size), jnp.float32)
    out_small = jax.block_until_ready(enhanced_dqn_5m_forward(x_small, prep))
    assert out_small.shape == (8, action_size)
    assert jnp.allclose(out_small, _reference(x_small, params), **TOL), \
        "small-batch mismatch vs reference"

    # Non-tile-multiple batch: exercises the bucketed tile + batch padding path
    # (B=300 -> tb=256, b_pad=512, grid of 2 -> both v7x TCs used).
    x_mid = jax.random.normal(kx3, (300, state_size), jnp.float32)
    out_mid = jax.block_until_ready(enhanced_dqn_5m_forward(x_mid, prep))
    assert out_mid.shape == (300, action_size)
    assert jnp.allclose(out_mid, _reference(x_mid, params), **TOL), \
        "mid-batch mismatch vs reference"

    # Larger training-style batch (B=512 -> tb=256, grid of 2, no padding).
    x_big = jax.random.normal(kx2, (512, state_size), jnp.float32)
    out_big = jax.block_until_ready(enhanced_dqn_5m_forward(x_big, prep))
    assert out_big.shape == (512, action_size)
    assert jnp.allclose(out_big, _reference(x_big, params), **TOL), \
        "large-batch mismatch vs reference"

    print("KERNEL_OK")
</pallas_src>

<mosaic_0001>
module attributes {stable_mosaic.version = 11 : i64} {
  func.func @_dqn_kernel(%arg0: i32, %arg1: memref<256x16xbf16, #tpu.memory_space<vmem>>, %arg2: memref<16x256xbf16, #tpu.memory_space<vmem>>, %arg3: memref<256x128xbf16, #tpu.memory_space<vmem>>, %arg4: memref<128x128xbf16, #tpu.memory_space<vmem>>, %arg5: memref<1x512xf32, #tpu.memory_space<vmem>>, %arg6: memref<256x128xf32, #tpu.memory_space<vmem>>) attributes {dimension_semantics = [#tpu.dimension_semantics<parallel>], iteration_bounds = array<i64: 2>, scalar_prefetch = 0 : i64, scratch_operands = 0 : i64, tpu.core_type = #tpu.core_type<tc>, window_params = [{transform_indices = @transform_0, window_bounds = array<i64: 256, 16>}, {pipeline_mode = #tpu.pipeline_mode<synchronous>, transform_indices = @transform_1, window_bounds = array<i64: 16, 256>}, {pipeline_mode = #tpu.pipeline_mode<synchronous>, transform_indices = @transform_2, window_bounds = array<i64: 256, 128>}, {pipeline_mode = #tpu.pipeline_mode<synchronous>, transform_indices = @transform_3, window_bounds = array<i64: 128, 128>}, {pipeline_mode = #tpu.pipeline_mode<synchronous>, transform_indices = @transform_4, window_bounds = array<i64: 1, 512>}, {transform_indices = @transform_5, window_bounds = array<i64: 256, 128>}]} {
    %c0 = arith.constant 0 : index
    %c0_0 = arith.constant 0 : index
    %0 = vector.load %arg5[%c0, %c0_0] : memref<1x512xf32, #tpu.memory_space<vmem>>, vector<1x256xf32>
    %c0_1 = arith.constant 0 : index
    %c256 = arith.constant 256 : index
    %1 = vector.load %arg5[%c0_1, %c256] : memref<1x512xf32, #tpu.memory_space<vmem>>, vector<1x128xf32>
    %c0_2 = arith.constant 0 : index
    %c384 = arith.constant 384 : index
    %2 = vector.load %arg5[%c0_2, %c384] : memref<1x512xf32, #tpu.memory_space<vmem>>, vector<1x128xf32>
    %c0_3 = arith.constant 0 : index
    %c0_4 = arith.constant 0 : index
    %3 = vector.load %arg1[%c0_3, %c0_4] : memref<256x16xbf16, #tpu.memory_space<vmem>>, vector<256x16xbf16>
    %c0_5 = arith.constant 0 : index
    %c0_6 = arith.constant 0 : index
    %4 = vector.load %arg2[%c0_5, %c0_6] : memref<16x256xbf16, #tpu.memory_space<vmem>>, vector<16x256xbf16>
    %cst = arith.constant dense<0.000000e+00> : vector<256x256xf32>
    %5 = tpu.matmul %3, %4, %cst {dimension_numbers = #tpu.dot_dimension_numbers<[1], [0], [0], [1], [0, 0, 1, 1], [], []>} : vector<256x16xbf16>, vector<16x256xbf16>, vector<256x256xf32> -> vector<256x256xf32>
    %6 = vector.broadcast %0 : vector<1x256xf32> to vector<256x256xf32>
    %7 = arith.addf %5, %6 : vector<256x256xf32>
    %cst_7 = arith.constant 0.000000e+00 : f32
    %8 = vector.broadcast %cst_7 : f32 to vector<256x256xf32>
    %9 = arith.maximumf %7, %8 : vector<256x256xf32>
    %10 = arith.truncf %9 : vector<256x256xf32> to vector<256x256xbf16>
    %c0_8 = arith.constant 0 : index
    %c0_9 = arith.constant 0 : index
    %11 = vector.load %arg3[%c0_8, %c0_9] : memref<256x128xbf16, #tpu.memory_space<vmem>>, vector<256x128xbf16>
    %cst_10 = arith.constant dense<0.000000e+00> : vector<256x128xf32>
    %12 = tpu.matmul %10, %11, %cst_10 {dimension_numbers = #tpu.dot_dimension_numbers<[1], [0], [0], [1], [0, 0, 1, 1], [], []>} : vector<256x256xbf16>, vector<256x128xbf16>, vector<256x128xf32> -> vector<256x128xf32>
    %13 = vector.broadcast %1 : vector<1x128xf32> to vector<256x128xf32>
    %14 = arith.addf %12, %13 : vector<256x128xf32>
    %cst_11 = arith.constant 0.000000e+00 : f32
    %15 = vector.broadcast %cst_11 : f32 to vector<256x128xf32>
    %16 = arith.maximumf %14, %15 : vector<256x128xf32>
    %17 = arith.truncf %16 : vector<256x128xf32> to vector<256x128xbf16>
    %c0_12 = arith.constant 0 : index
    %c0_13 = arith.constant 0 : index
    %18 = vector.load %arg4[%c0_12, %c0_13] : memref<128x128xbf16, #tpu.memory_space<vmem>>, vector<128x128xbf16>
    %cst_14 = arith.constant dense<0.000000e+00> : vector<256x128xf32>
    %19 = tpu.matmul %17, %18, %cst_14 {dimension_numbers = #tpu.dot_dimension_numbers<[1], [0], [0], [1], [0, 0, 1, 1], [], []>} : vector<256x128xbf16>, vector<128x128xbf16>, vector<256x128xf32> -> vector<256x128xf32>
    %20 = vector.broadcast %2 : vector<1x128xf32> to vector<256x128xf32>
    %21 = arith.addf %19, %20 : vector<256x128xf32>
    %c0_15 = arith.constant 0 : index
    %c0_16 = arith.constant 0 : index
    %22 = vector.load %arg6[%c0_15, %c0_16] : memref<256x128xf32, #tpu.memory_space<vmem>>, vector<256x128xf32>
    tpu.vector_store %arg6[%c0_15, %c0_16], %21 {strides = array<i32>} : memref<256x128xf32, #tpu.memory_space<vmem>>, vector<256x128xf32>,
    return
  }
  func.func @transform_0(%arg0: i32) -> (i32, i32) {
    %c0_i32 = arith.constant 0 : i32
    %c0_i32_0 = arith.constant 0 : i32
    return %arg0, %c0_i32 : i32, i32
  }
  func.func @transform_1(%arg0: i32) -> (i32, i32) {
    %c0_i32 = arith.constant 0 : i32
    %c0_i32_0 = arith.constant 0 : i32
    %c0_i32_1 = arith.constant 0 : i32
    return %c0_i32, %c0_i32_0 : i32, i32
  }
  func.func @transform_2(%arg0: i32) -> (i32, i32) {
    %c0_i32 = arith.constant 0 : i32
    %c0_i32_0 = arith.constant 0 : i32
    %c0_i32_1 = arith.constant 0 : i32
    return %c0_i32, %c0_i32_0 : i32, i32
  }
  func.func @transform_3(%arg0: i32) -> (i32, i32) {
    %c0_i32 = arith.constant 0 : i32
    %c0_i32_0 = arith.constant 0 : i32
    %c0_i32_1 = arith.constant 0 : i32
    return %c0_i32, %c0_i32_0 : i32, i32
  }
  func.func @transform_4(%arg0: i32) -> (i32, i32) {
    %c0_i32 = arith.constant 0 : i32
    %c0_i32_0 = arith.constant 0 : i32
    %c0_i32_1 = arith.constant 0 : i32
    return %c0_i32, %c0_i32_0 : i32, i32
  }
  func.func @transform_5(%arg0: i32) -> (i32, i32) {
    %c0_i32 = arith.constant 0 : i32
    %c0_i32_0 = arith.constant 0 : i32
    return %arg0, %c0_i32 : i32, i32
  }
}

</mosaic_0001>

<bundles_post_ra>
// kernel: tpu_custom_call.1
= control target key start
LH: loop header
LB: loop body
LE: loop exit
PB: predicated region body
PF: predicated region fallthrough
CT: control target
= control target key end

     0   :  { %10 = vsyncpa [#allocation3], 0  ;;  %s2202_s0 = inlined_call_operand.vmem [shape: bf16[512,16], index: 0, kind: input, shape index: {}]   ;;  %s2203_s1 = inlined_call_operand.vmem [shape: bf16[16,256], index: 1, kind: input, shape index: {}]   ;;  %s2204_s2 = inlined_call_operand.vmem [shape: bf16[256,128], index: 2, kind: input, shape index: {}]   ;;  %s2205_s3 = inlined_call_operand.vmem [shape: bf16[128,128], index: 3, kind: input, shape index: {}]   ;;  %s2206_s4 = inlined_call_operand.vmem [shape: f32[1,512], index: 4, kind: input, shape index: {}]   ;;  %s2207_s5 = inlined_call_operand.hbm [shape: f32[512,128], index: 5, kind: output, shape index: {}]  }
   0x1   :  { %12 = vsyncpa [#allocation3 + $0x1], 0  ;;  %s1710_s18 = smov 0   ;;  %s1712_s19 = smov 0  }
   0x2   :  { %s1714_s20 = smov 0   ;;  %s1716_s21 = smov 0  }
   0x3 LB: > { %s1731_s22 = sadd.s32 4294967295, %s1676_s21   ;;  %s1305_s23 = sadd.s32 4294967294, %s1676_s21   ;;  %s1676_s21 = sphi %s1716_s21, %s2213_s21   ;;  %s1672_s20 = sphi %s1714_s20, %s2212_s20   ;;  %s1668_s19 = sphi %s1712_s19, %s2211_s19   ;;  %s1664_s18 = sphi %s1710_s18, %s2210_s18  }
   0x4   : > { %s1735_s24 = sadd.s32 1, %s1676_s21   ;;  %s135_s25 = sadd.s32 1, %s1672_s20 }
   0x5   : > { %s132_s26 = ssub.s32 %s1676_s21, %s1735_s24  ;;  %p145_p0 = scmp.ne.s32.totalorder %s1672_s20, %s1668_s19 }
   0x6   : > { %p133_p1 = scmp.eq.s32.totalorder %s132_s26, 0  ;;  %p146_p2 = scmp.eq.s32.totalorder %s1731_s22, 1 }
   0x7   : > { %p151_p3 = scmp.ne.s32.totalorder %s1668_s19, %s1664_s18  ;;  %p152_p4 = scmp.eq.s32.totalorder %s1305_s23, 1 }
   0x8   : > { %s1746_s27 = scalar_select %p133_p1, %s1672_s20, %s135_s25  }
   0x9   : > { %p1748_p5 = por %p146_p2, %p145_p0  ;;  %p1752_p6 = por %p152_p4, %p151_p3 }
   0xa   : > { %p1308_p7 = scmp.ge.s32.totalorder %s1676_s21, 1  ;;  %p191_p8 = scmp.lt.s32.totalorder %s1676_s21, 3 }
   0xc   : > { %p192_p9 = pnand %p1308_p7, %p191_p8 }
   0xd   : > { %s1310_s9 = sshll.u32 (!%p192_p9), %s1731_s22, 5  ;;  %s216_s7 = sand.u32 (!%p192_p9), 1, %s1668_s19  }
   0xe   : > { %195 = sbr.rel (%p192_p9) target bundleno = 777 (0x309), region = 40  ;;  %p220_p10 = scmp.lt.s32.totalorder (!%p192_p9), %s1310_s9, 63 }
   0xf   : > { %s1309_s8 = sshll.u32 (!%p192_p9), %s216_s7, 8  ;;  %s1559_s12 = sshll.u32 (!%p192_p9), %s1731_s22, 8 }
  0x10   : > { %s2089_s11 = scalar_lea.vmem (!%p192_p9), [#allocation2], %s1309_s8  ;;  %s1239_s15 = scalar_lea.hbm (!%p192_p9), %s2207_s5, %s1559_s12 }
  0x11   : > { %s1240_s16 = sshll.u32 (!%p192_p9), %s2089_s11, 4  ;;  %s1228_s23 = scalar_lea.sflag (!%p192_p9), [#allocation3], %s216_s7  ;;  %s1241_s16 = int_to_ptr.vmem [resolvable:$true] %s1240_s16 }
  0x12   : > { %s1634_s6 = scalar_lea.hbm (!%p192_p9), %s2207_s5, 512 }
  0x13   : > { %v1378_v0 = vld [vmem:[%s2203_s1] sm:$0xf]  ;;  %v1534_v1 = vld [vmem:[%s2203_s1 + $0x4] sm:$0xf0]  ;;  %v1533_v3 = vld [vmem:[%s2203_s1 + $0x4] sm:$0xf] }
  0x14   : > { %v1379_v2 = vor.u32 %v1534_v1, %v1378_v0  ;;  %v1380_v4 = vld [vmem:[%s2203_s1 + $0x8] sm:$0xf0]  ;;  %s2215_s9 = smov (!%p220_p10, %s1310_s9), 63  ;;  %vm359_vm0 = vcmask 130048   ;;  %v1542_v17 = vld [vmem:[%s2204_s2 + $0x38] sm:$0xff]  ;;  %v1541_v18 = vld [vmem:[%s2204_s2 + $0x30] sm:$0xff] }
  0x15   : > { %v1383_v5 = vor.u32 %v1533_v3, %v1380_v4  ;;  %s1311_s14 = sshll.u32 %s2215_s9, 2  ;;  %v1540_v20 = vld [vmem:[%s2204_s2 + $0x28] sm:$0xff]  ;;  %v1539_v21 = vld [vmem:[%s2204_s2 + $0x20] sm:$0xff]  ;;  %v1538_v22 = vld [vmem:[%s2204_s2 + $0x18] sm:$0xff] }
  0x16   : > { %415 = vmatpush.bf16.msra.mxu0 %v1379_v2  ;;  %1560 = vmatpush.bf16.msra.mxu1 %v1379_v2  ;;  %s1774_s17 = scalar_lea.vmem %s2202_s0, %s1311_s14  ;;  %v1537_v23 = vld [vmem:[%s2204_s2 + $0x10] sm:$0xff]  ;;  %v1536_v24 = vld [vmem:[%s2204_s2 + $0x8] sm:$0xff]  ;;  %v1535_v25 = vld [vmem:[%s2204_s2] sm:$0xff] }
  0x17   : > { %1561 = vmatpush.bf16.msra.mxu2 %v1379_v2  ;;  %1562 = vmatpush.bf16.msra.mxu3 %v1379_v2  ;;  %v1517_v6 = vld [vmem:[%s1774_s17] sm:$0xff]  ;;  %v1778_v7 = vld [vmem:[%s1774_s17 + $0x28] sm:$0xff]  ;;  %v1785_v9 = vld [vmem:[%s1774_s17 + $0x30] sm:$0xff] }
  0x18   : > { %v1518_v8 = vld [vmem:[%s1774_s17 + $0x8] sm:$0xff]  ;;  %v1519_v10 = vld [vmem:[%s1774_s17 + $0x10] sm:$0xff]  ;;  %v1792_v11 = vld [vmem:[%s1774_s17 + $0x38] sm:$0xff] }
  0x19   : > { %1384 = vmatmul.msk.bf16.vlgmr.msra.gmra.mxu0 %vm359_vm0, %v1517_v6  ;;  %1389 = vmatmul.msk.bf16.vlgmr.msra.gmra.mxu1 %vm359_vm0, %v1778_v7  ;;  %v1520_v12 = vld [vmem:[%s1774_s17 + $0x18] sm:$0xff]  ;;  %v1799_v13 = vld [vmem:[%s1774_s17 + $0x40] sm:$0xff]  ;;  %v1806_v15 = vld [vmem:[%s1774_s17 + $0x48] sm:$0xff] }
  0x1a   : > { %504 = vmatpush.bf16.msrb.mxu1 %v1383_v5  ;;  %v1521_v14 = vld [vmem:[%s1774_s17 + $0x20] sm:$0xff]  ;;  %v1812_v16 = vld [vmem:[%s1774_s17 + $0x50] sm:$0xff]  ;;  %v1824_v19 = vld [vmem:[%s1774_s17 + $0x58] sm:$0xff] }
  0x1b   : > { %1394 = vmatmul.msk.bf16.vlgmr.msra.gmra.mxu2 %vm359_vm0, %v1812_v16  ;;  %v1849_v26 = vld [vmem:[%s1774_s17 + $0x60] sm:$0xff]  ;;  %v1550_v27 = vld [vmem:[%s2204_s2 + $0x78] sm:$0xff]  ;;  %v1866_v32 = vld [vmem:[%s1774_s17 + $0x68] sm:$0xff] }
  0x1c   : > { %813 = vmatpush.bf16.msrb.mxu2 %v1542_v17  ;;  %1396 = vmatmul.msk.bf16.vlgmr.msra.gmra.mxu3 %vm359_vm0, %v1849_v26  ;;  %v1859_v28 = vld [vmem:[%s2206_s4] sm:$0x3]  ;;  %v1549_v33 = vld [vmem:[%s2204_s2 + $0x70] sm:$0xff]  ;;  %v1548_v46 = vld [vmem:[%s2204_s2 + $0x68] sm:$0xff] }
  0x1d   : > { %902 = vmatpush.bf16.msrb.mxu3 %v1550_v27  ;;  %v1862_v31 = vperm.slane %v1859_v28, 0  ;;  %v1884_v49 = vld [vmem:[%s1774_s17 + $0x70] sm:$0xff]  ;;  %v1547_v50 = vld [vmem:[%s2204_s2 + $0x60] sm:$0xff]  ;;  %v1546_v63 = vld [vmem:[%s2204_s2 + $0x58] sm:$0xff] }
  0x1e   : > { %v1903_v2 = vld [vmem:[%s1774_s17 + $0x78] sm:$0xff]  ;;  %v1545_v3 = vld [vmem:[%s2204_s2 + $0x50] sm:$0xff]  ;;  %s1242_s17 = sshll.u32 %s1239_s15, 4  ;;  %s1243_s17 = int_to_ptr.hbm [resolvable:$true] %s1242_s17 }
  0x1f   : > { %s1628_s22 = sshra.s32 %s1243_s17, 4  ;;  %s1629_s22 = int_to_ptr.hbm [resolvable:$true] %s1628_s22 }
  0x20   : > { %814 = vmatpush.bf16.msrb.mxu2 %v1541_v18  ;;  %s1630_s25 = scalar_lea.hbm %s1629_s22, 256  ;;  %p1635_p0 = scmp.lt.s32.totalorder %s1629_s22, %s2207_s5 }
  0x21   : > { %903 = vmatpush.bf16.msrb.mxu3 %v1549_v33  ;;  %p1631_p11 = scmp.ne.s32.totalorder %s1629_s22, %s1630_s25  ;;  %p1636_p1 = scmp.lt.s32.totalorder %s1634_s6, %s1630_s25 }
  0x23   : > { %p1632_p12 = pnand %p1631_p11, %p1748_p5  ;;  %p1637_p2 = por %p1636_p1, %p1635_p0 }
  0x24   : > { %815 = vmatpush.bf16.msrb.mxu2 %v1540_v20 }
  0x25   : > { %904 = vmatpush.bf16.msrb.mxu3 %v1548_v46  ;;  %p1633_p13 = pneg %p1632_p12 }
  0x27   : > { %p1638_p3 = pnand %p1637_p2, %p1633_p13 }
  0x28   : > { %816 = vmatpush.bf16.msrb.mxu2 %v1539_v21 }
  0x29   : > { %1385 = vmatmul.msk.bf16.gmra.mxu0 %vm359_vm0, %v1518_v8  ;;  %1390 = vmatmul.msk.bf16.gmra.mxu1 %vm359_vm0, %v1785_v9 }
  0x2a   : > { %905 = vmatpush.bf16.msrb.mxu3 %v1547_v50 }
  0x2b   : > { %1395 = vmatmul.msk.bf16.gmra.mxu2 %vm359_vm0, %v1824_v19 }
  0x2c   : > { %817 = vmatpush.bf16.msrb.mxu2 %v1538_v22  ;;  %1397 = vmatmul.msk.bf16.gmra.mxu3 %vm359_vm0, %v1866_v32  ;;  %v1544_v22 = vld [vmem:[%s2204_s2 + $0x48] sm:$0xff] }
  0x2e   : > { %906 = vmatpush.bf16.msrb.mxu3 %v1546_v63 }
  0x30   : > { %818 = vmatpush.bf16.msrb.mxu2 %v1537_v23 }
  0x32   : > { %907 = vmatpush.bf16.msrb.mxu3 %v1545_v3 }
  0x34   : > { %819 = vmatpush.bf16.msrb.mxu2 %v1536_v24 }
  0x36   : > { %908 = vmatpush.bf16.msrb.mxu3 %v1544_v22 }
  0x38   : > { %820 = vmatpush.bf16.msrb.mxu2 %v1535_v25  ;;  %v1543_v25 = vld [vmem:[%s2204_s2 + $0x40] sm:$0xff] }
  0x39   : > { %1386 = vmatmul.msk.bf16.gmra.mxu0 %vm359_vm0, %v1519_v10  ;;  %1391 = vmatmul.msk.bf16.gmra.mxu1 %vm359_vm0, %v1792_v11 }
  0x3a   : > { %909 = vmatpush.bf16.msrb.mxu3 %v1543_v25 }
  0x3c   : > { %1398 = vmatmul.msk.bf16.gmra.mxu3 %vm359_vm0, %v1884_v49 }
  0x49   : > { %1387 = vmatmul.msk.bf16.gmra.mxu0 %vm359_vm0, %v1520_v12  ;;  %1392 = vmatmul.msk.bf16.gmra.mxu1 %vm359_vm0, %v1799_v13 }
  0x4c   : > { %1399 = vmatmul.msk.bf16.gmra.mxu3 %vm359_vm0, %v1903_v2 }
  0x59   : > { %1388 = vmatmul.msk.bf16.gmra.mxu0 %vm359_vm0, %v1521_v14  ;;  %1393 = vmatmul.msk.bf16.gmra.mxu1 %vm359_vm0, %v1806_v15 }
  0x69   : > { %1400 = vmatmul.msk.bf16.vlgmr.msrb.gmra.mxu1 %vm359_vm0, %v1517_v6 }
  0x79   : > { %1401 = vmatmul.msk.bf16.gmra.mxu1 %vm359_vm0, %v1518_v8 }
  0x89   : > { %1402 = vmatmul.msk.bf16.gmra.mxu1 %vm359_vm0, %v1519_v10 }
  0x96   : > { %v417_v29 = vpop.f32.mrf.mxu0  ;;  %v442_v30 = vpop.f32.mrf.mxu1 }
  0x97   : > { %v418_v34 = vadd.f32 %v417_v29, %v1862_v31  ;;  %v443_v35 = vadd.f32 %v442_v30, %v1862_v31 }
  0x99   : > { %1403 = vmatmul.msk.bf16.gmra.mxu1 %vm359_vm0, %v1520_v12  ;;  %v586_v38 = vmax.f32 %v418_v34, 0.0  ;;  %v606_v41 = vmax.f32 %v443_v35, 0.0 }
  0x9e   : > { %v419_v36 = vpop.f32.mrf.mxu0  ;;  %v444_v37 = vpop.f32.mrf.mxu1 }
  0x9f   : > { %v420_v39 = vadd.f32 %v419_v36, %v1862_v31  ;;  %v445_v40 = vadd.f32 %v444_v37, %v1862_v31 }
  0xa1   : > { %v588_v42 = vmax.f32 %v420_v39, 0.0  ;;  %v608_v43 = vmax.f32 %v445_v40, 0.0 }
  0xa3   : > { %v650_v44 = vpack.c.bf16 %v588_v42, %v586_v38  ;;  %v1877_v45 = vpack.c.bf16 %v608_v43, %v606_v41 }
  0xa5   : > { %821 = vmatmul.bf16.vlgmr.msrb.gmra.mxu2 %v650_v44 }
  0xa6   : > { %v422_v47 = vpop.f32.mrf.mxu0  ;;  %v447_v48 = vpop.f32.mrf.mxu1 }
  0xa7   : > { %v423_v51 = vadd.f32 %v422_v47, %v1862_v31  ;;  %v448_v52 = vadd.f32 %v447_v48, %v1862_v31 }
  0xa9   : > { %1404 = vmatmul.msk.bf16.gmra.mxu1 %vm359_vm0, %v1521_v14  ;;  %v590_v55 = vmax.f32 %v423_v51, 0.0  ;;  %v610_v58 = vmax.f32 %v448_v52, 0.0 }
  0xae   : > { %v424_v53 = vpop.f32.mrf.mxu0  ;;  %v449_v54 = vpop.f32.mrf.mxu1 }
  0xaf   : > { %v425_v56 = vadd.f32 %v424_v53, %v1862_v31  ;;  %v450_v57 = vadd.f32 %v449_v54, %v1862_v31 }
  0xb1   : > { %v592_v59 = vmax.f32 %v425_v56, 0.0  ;;  %v612_v60 = vmax.f32 %v450_v57, 0.0 }
  0xb3   : > { %v652_v61 = vpack.c.bf16 %v592_v59, %v590_v55  ;;  %v1895_v62 = vpack.c.bf16 %v612_v60, %v610_v58 }
  0xb5   : > { %826 = vmatmul.bf16.gmra.mxu2 %v652_v61 }
  0xb6   : > { %v427_v0 = vpop.f32.mrf.mxu0  ;;  %v452_v1 = vpop.f32.mrf.mxu1 }
  0xb7   : > { %v428_v4 = vadd.f32 %v427_v0, %v1862_v31  ;;  %v453_v5 = vadd.f32 %v452_v1, %v1862_v31 }
  0xb9   : > { %1405 = vmatmul.msk.bf16.gmra.mxu1 %vm359_vm0, %v1778_v7  ;;  %v594_v10 = vmax.f32 %v428_v4, 0.0  ;;  %v614_v14 = vmax.f32 %v453_v5, 0.0 }
  0xbe   : > { %v429_v6 = vpop.f32.mrf.mxu0  ;;  %v454_v8 = vpop.f32.mrf.mxu1 }
  0xbf   : > { %v430_v12 = vadd.f32 %v429_v6, %v1862_v31  ;;  %v455_v7 = vadd.f32 %v454_v8, %v1862_v31 }
  0xc1   : > { %v596_v17 = vmax.f32 %v430_v12, 0.0  ;;  %v616_v18 = vmax.f32 %v455_v7, 0.0 }
  0xc3   : > { %v654_v20 = vpack.c.bf16 %v596_v17, %v594_v10  ;;  %v1914_v21 = vpack.c.bf16 %v616_v18, %v614_v14  ;;  %v467_v10 = vpop.f32.mrf.mxu2 }
  0xc5   : > { %831 = vmatmul.bf16.gmra.mxu2 %v654_v20 }
  0xc6   : > { %v432_v23 = vpop.f32.mrf.mxu0  ;;  %v457_v24 = vpop.f32.mrf.mxu1 }
  0xc7   : > { %v433_v27 = vadd.f32 %v432_v23, %v1862_v31  ;;  %v458_v29 = vadd.f32 %v457_v24, %v1862_v31 }
  0xc9   : > { %1406 = vmatmul.msk.bf16.gmra.mxu1 %vm359_vm0, %v1785_v9  ;;  %v598_v34 = vmax.f32 %v433_v27, 0.0  ;;  %v618_v37 = vmax.f32 %v458_v29, 0.0 }
  0xcb   : > { %v469_v20 = vpop.f32.mrf.mxu2 }
  0xce   : > { %v434_v30 = vpop.f32.mrf.mxu0  ;;  %v459_v33 = vpop.f32.mrf.mxu1 }
  0xcf   : > { %v435_v35 = vadd.f32 %v434_v30, %v1862_v31  ;;  %v460_v36 = vadd.f32 %v459_v33, %v1862_v31 }
  0xd1   : > { %v600_v38 = vmax.f32 %v435_v35, 0.0  ;;  %v620_v39 = vmax.f32 %v460_v36, 0.0 }
  0xd3   : > { %v656_v9 = vpack.c.bf16 %v600_v38, %v598_v34  ;;  %v666_v40 = vpack.c.bf16 %v620_v39, %v618_v37  ;;  %v472_v25 = vpop.f32.mrf.mxu2 }
  0xd5   : > { %836 = vmatmul.bf16.gmra.mxu2 %v656_v9 }
  0xd6   : > { %v437_v41 = vpop.f32.mrf.mxu0  ;;  %v462_v42 = vpop.f32.mrf.mxu1 }
  0xd7   : > { %v438_v43 = vadd.f32 %v437_v41, %v1862_v31  ;;  %v463_v44 = vadd.f32 %v462_v42, %v1862_v31  ;;  %v470_v41 = vadd.f32 %v469_v20, %v1862_v31  ;;  %v1557_v42 = vld [vmem:[%s2205_s3 + $0x30] sm:$0xff] }
  0xd9   : > { %1407 = vmatmul.msk.bf16.gmra.mxu1 %vm359_vm0, %v1792_v11  ;;  %v602_v48 = vmax.f32 %v438_v43, 0.0  ;;  %v622_v52 = vmax.f32 %v463_v44, 0.0  ;;  %v1935_v11 = vperm.slane %v1859_v28, 1  ;;  %v628_v44 = vmax.f32 %v470_v41, 0.0 }
  0xdb   : > { %v474_v30 = vpop.f32.mrf.mxu2 }
  0xde   : > { %v439_v46 = vpop.f32.mrf.mxu0  ;;  %v464_v47 = vpop.f32.mrf.mxu1 }
  0xdf   : > { %v440_v50 = vadd.f32 %v439_v46, %v1862_v31  ;;  %v465_v51 = vadd.f32 %v464_v47, %v1862_v31 }
  0xe1   : > { %v604_v53 = vmax.f32 %v440_v50, 0.0  ;;  %v624_v54 = vmax.f32 %v465_v51, 0.0 }
  0xe3   : > { %v658_v55 = vpack.c.bf16 %v604_v53, %v602_v48  ;;  %v668_v56 = vpack.c.bf16 %v624_v54, %v622_v52  ;;  %v1556_v54 = vld [vmem:[%s2205_s3 + $0x28] sm:$0xff] }
  0xe5   : > { %841 = vmatmul.bf16.gmra.mxu2 %v658_v55 }
  0xe6   : > { %v506_v57 = vpop.f32.mrf.mxu1 }
  0xe7   : > { %v507_v58 = vadd.f32 %v506_v57, %v1935_v11 }
  0xe9   : > { %1408 = vmatmul.msk.bf16.gmra.mxu1 %vm359_vm0, %v1799_v13  ;;  %v587_v61 = vmax.f32 %v507_v58, 0.0  ;;  %v473_v58 = vadd.f32 %v472_v25, %v1862_v31  ;;  %v1551_v25 = vld [vmem:[%s2205_s3] sm:$0xff] }
  0xee   : > { %v508_v59 = vpop.f32.mrf.mxu1 }
  0xef   : > { %v509_v60 = vadd.f32 %v508_v59, %v1935_v11  ;;  %v475_v59 = vadd.f32 %v474_v30, %v1862_v31 }
  0xf1   : > { %v589_v63 = vmax.f32 %v509_v60, 0.0  ;;  %v1555_v60 = vld [vmem:[%s2205_s3 + $0x20] sm:$0xff] }
  0xf3   : > { %v651_v0 = vpack.c.bf16 %v589_v63, %v587_v61  ;;  %v630_v63 = vmax.f32 %v473_v58, 0.0 }
  0xf5   : > { %846 = vmatmul.bf16.gmra.mxu2 %v1877_v45  ;;  %910 = vmatmul.bf16.vlgmr.msrb.gmra.mxu3 %v651_v0  ;;  %v632_v0 = vmax.f32 %v475_v59, 0.0 }
  0xf6   : > { %v511_v1 = vpop.f32.mrf.mxu1 }
  0xf7   : > { %v512_v28 = vadd.f32 %v511_v1, %v1935_v11 }
  0xf9   : > { %1409 = vmatmul.msk.bf16.gmra.mxu1 %vm359_vm0, %v1806_v15  ;;  %v591_v4 = vmax.f32 %v512_v28, 0.0 }
  0xfe   : > { %v513_v3 = vpop.f32.mrf.mxu1 }
  0xff   : > { %v514_v13 = vadd.f32 %v513_v3, %v1935_v11 }
 0x101   : > { %v593_v5 = vmax.f32 %v514_v13, 0.0 }
 0x103   : > { %v653_v6 = vpack.c.bf16 %v593_v5, %v591_v4  ;;  %v672_v5 = vpack.c.bf16 %v632_v0, %v630_v63 }
 0x105   : > { %851 = vmatmul.bf16.gmra.mxu2 %v1895_v62  ;;  %915 = vmatmul.bf16.gmra.mxu3 %v653_v6 }
 0x106   : > { %v516_v8 = vpop.f32.mrf.mxu1 }
 0x107   : > { %v517_v45 = vadd.f32 %v516_v8, %v1935_v11 }
 0x109   : > { %1410 = vmatmul.msk.bf16.gmra.mxu1 %vm359_vm0, %v1812_v16  ;;  %v595_v7 = vmax.f32 %v517_v45, 0.0  ;;  %v1554_v45 = vld [vmem:[%s2205_s3 + $0x18] sm:$0xff] }
 0x10e   : > { %v518_v12 = vpop.f32.mrf.mxu1 }
 0x10f   : > { %v519_v15 = vadd.f32 %v518_v12, %v1935_v11  ;;  %v1553_v12 = vld [vmem:[%s2205_s3 + $0x10] sm:$0xff] }
 0x111   : > { %v597_v14 = vmax.f32 %v519_v15, 0.0 }
 0x113   : > { %v655_v17 = vpack.c.bf16 %v597_v14, %v595_v7 }
 0x115   : > { %856 = vmatmul.bf16.gmra.mxu2 %v1914_v21  ;;  %920 = vmatmul.bf16.gmra.mxu3 %v655_v17  ;;  %v1558_v21 = vld [vmem:[%s2205_s3 + $0x38] sm:$0xff] }
 0x116   : > { %v521_v18 = vpop.f32.mrf.mxu1  ;;  %1106 = vmatpush.bf16.msrb.mxu0 %v1558_v21  ;;  %1563 = vmatpush.bf16.msra.mxu2 %v1558_v21 }
 0x117   : > { %v522_v62 = vadd.f32 %v521_v18, %v1935_v11 }
 0x119   : > { %1411 = vmatmul.msk.bf16.gmra.mxu1 %vm359_vm0, %v1824_v19  ;;  %v599_v23 = vmax.f32 %v522_v62, 0.0  ;;  %v1961_v19 = vpop.f32.mrf.mxu3 }
 0x11a   : > { %1107 = vmatpush.bf16.msrb.mxu0 %v1557_v42  ;;  %1564 = vmatpush.bf16.msra.mxu2 %v1557_v42  ;;  %v478_v15 = vadd.f32 %v1961_v19, %v1862_v31 }
 0x11c   : > { %v634_v62 = vmax.f32 %v478_v15, 0.0 }
 0x11e   : > { %v523_v16 = vpop.f32.mrf.mxu1  ;;  %1108 = vmatpush.bf16.msrb.mxu0 %v1556_v54  ;;  %1565 = vmatpush.bf16.msra.mxu2 %v1556_v54 }
 0x11f   : > { %v524_v22 = vadd.f32 %v523_v16, %v1935_v11 }
 0x121   : > { %v601_v24 = vmax.f32 %v524_v22, 0.0  ;;  %v479_v39 = vpop.f32.mrf.mxu3 }
 0x122   : > { %1109 = vmatpush.bf16.msrb.mxu0 %v1555_v60  ;;  %1566 = vmatpush.bf16.msra.mxu2 %v1555_v60  ;;  %v480_v7 = vadd.f32 %v479_v39, %v1862_v31 }
 0x123   : > { %v657_v27 = vpack.c.bf16 %v601_v24, %v599_v23 }
 0x124   : > { %v636_v16 = vmax.f32 %v480_v7, 0.0 }
 0x125   : > { %861 = vmatmul.bf16.gmra.mxu2 %v666_v40  ;;  %925 = vmatmul.bf16.gmra.mxu3 %v657_v27  ;;  %v468_v40 = vadd.f32 %v467_v10, %v1862_v31 }
 0x126   : > { %v526_v29 = vpop.f32.mrf.mxu1  ;;  %1110 = vmatpush.bf16.msrb.mxu0 %v1554_v45  ;;  %1567 = vmatpush.bf16.msra.mxu2 %v1554_v45  ;;  %v674_v27 = vpack.c.bf16 %v636_v16, %v634_v62 }
 0x127   : > { %v527_v33 = vadd.f32 %v526_v29, %v1935_v11  ;;  %v626_v43 = vmax.f32 %v468_v40, 0.0 }
 0x129   : > { %1412 = vmatmul.msk.bf16.gmra.mxu1 %vm359_vm0, %v1849_v26  ;;  %v603_v36 = vmax.f32 %v527_v33, 0.0  ;;  %v1965_v26 = vpop.f32.mrf.mxu2  ;;  %v1975_v48 = vpop.f32.mrf.mxu3 }
 0x12a   : > { %1111 = vmatpush.bf16.msrb.mxu0 %v1553_v12  ;;  %1568 = vmatpush.bf16.msra.mxu2 %v1553_v12  ;;  %v483_v33 = vadd.f32 %v1975_v48, %v1862_v31  ;;  %v2029_v48 = vld [vmem:[%s2206_s4 + $0x2] ss:$0 sm:$0xff] }
 0x12e   : > { %v528_v34 = vpop.f32.mrf.mxu1 }
 0x12f   : > { %v529_v35 = vadd.f32 %v528_v34, %v1935_v11 }
 0x131   : > { %v605_v37 = vmax.f32 %v529_v35, 0.0  ;;  %v1978_v51 = vpop.f32.mrf.mxu2  ;;  %v484_v57 = vpop.f32.mrf.mxu3 }
 0x132   : > { %v485_v34 = vadd.f32 %v484_v57, %v1862_v31 }
 0x133   : > { %v659_v38 = vpack.c.bf16 %v605_v37, %v603_v36  ;;  %v638_v37 = vmax.f32 %v483_v33, 0.0 }
 0x135   : > { %866 = vmatmul.bf16.gmra.mxu2 %v668_v56  ;;  %930 = vmatmul.bf16.gmra.mxu3 %v659_v38  ;;  %v640_v38 = vmax.f32 %v485_v34, 0.0 }
 0x136   : > { %v531_v9 = vpop.f32.mrf.mxu1 }
 0x137   : > { %v532_v46 = vadd.f32 %v531_v9, %v1935_v11 }
 0x139   : > { %1413 = vmatmul.msk.bf16.gmra.mxu1 %vm359_vm0, %v1866_v32  ;;  %v607_v52 = vmax.f32 %v532_v46, 0.0  ;;  %v670_v32 = vpack.c.bf16 %v628_v44, %v626_v43  ;;  %v1990_v61 = vpop.f32.mrf.mxu2  ;;  %v487_v6 = vpop.f32.mrf.mxu3  ;;  %v676_v44 = vpack.c.bf16 %v640_v38, %v638_v37 }
 0x13a   : > { %v828_v12 = vadd.f32 %v2029_v48, %v1990_v61 }
 0x13e   : > { %v533_v47 = vpop.f32.mrf.mxu1 }
 0x13f   : > { %v534_v50 = vadd.f32 %v533_v47, %v1935_v11 }
 0x141   : > { %v609_v53 = vmax.f32 %v534_v50, 0.0  ;;  %v1994_v8 = vpop.f32.mrf.mxu2  ;;  %v489_v14 = vpop.f32.mrf.mxu3  ;;  %v488_v50 = vadd.f32 %v487_v6, %v1862_v31 }
 0x142   : > { %v830_v7 = vadd.f32 %v2029_v48, %v1994_v8 }
 0x143   : > { %v661_v55 = vpack.c.bf16 %v609_v53, %v607_v52  ;;  %v490_v52 = vadd.f32 %v489_v14, %v1862_v31  ;;  %v642_v57 = vmax.f32 %v488_v50, 0.0 }
 0x145   : > { %871 = vmatmul.bf16.gmra.mxu2 %v670_v32  ;;  %935 = vmatmul.bf16.gmra.mxu3 %v661_v55  ;;  %v823_v32 = vadd.f32 %v2029_v48, %v1965_v26  ;;  %v825_v55 = vadd.f32 %v2029_v48, %v1978_v51  ;;  %v644_v58 = vmax.f32 %v490_v52, 0.0 }
 0x146   : > { %v536_v56 = vpop.f32.mrf.mxu1 }
 0x147   : > { %v537_v1 = vadd.f32 %v536_v56, %v1935_v11 }
 0x149   : > { %1414 = vmatmul.msk.bf16.gmra.mxu1 %vm359_vm0, %v1884_v49  ;;  %v611_v13 = vmax.f32 %v537_v1, 0.0  ;;  %v2008_v18 = vpop.f32.mrf.mxu2  ;;  %v492_v21 = vpop.f32.mrf.mxu3 }
 0x14a   : > { %v493_v45 = vadd.f32 %v492_v21, %v1862_v31  ;;  %v833_v34 = vadd.f32 %v2029_v48, %v2008_v18 }
 0x14e   : > { %v538_v28 = vpop.f32.mrf.mxu1 }
 0x14f   : > { %v539_v3 = vadd.f32 %v538_v28, %v1935_v11 }
 0x151   : > { %v613_v4 = vmax.f32 %v539_v3, 0.0  ;;  %v2017_v30 = vpop.f32.mrf.mxu2  ;;  %v494_v9 = vpop.f32.mrf.mxu3 }
 0x152   : > { %v835_v37 = vadd.f32 %v2029_v48, %v2017_v30 }
 0x153   : > { %v663_v49 = vpack.c.bf16 %v613_v4, %v611_v13 }
 0x155   : > { %876 = vmatmul.bf16.gmra.mxu2 %v672_v5  ;;  %940 = vmatmul.bf16.gmra.mxu3 %v663_v49  ;;  %v678_v5 = vpack.c.bf16 %v644_v58, %v642_v57 }
 0x156   : > { %v541_v10 = vpop.f32.mrf.mxu1 }
 0x157   : > { %v542_v17 = vadd.f32 %v541_v10, %v1935_v11  ;;  %v495_v10 = vadd.f32 %v494_v9, %v1862_v31 }
 0x159   : > { %1415 = vmatmul.msk.bf16.gmra.mxu1 %vm359_vm0, %v1903_v2  ;;  %v1552_v2 = vld [vmem:[%s2205_s3 + $0x8] sm:$0xff]  ;;  %v615_v23 = vmax.f32 %v542_v17, 0.0  ;;  %v2024_v42 = vpop.f32.mrf.mxu2  ;;  %v646_v17 = vmax.f32 %v493_v45, 0.0 }
 0x15a   : > { %1112 = vmatpush.bf16.msrb.mxu0 %v1552_v2  ;;  %1569 = vmatpush.bf16.msra.mxu2 %v1552_v2 }
 0x15e   : > { %v543_v20 = vpop.f32.mrf.mxu1  ;;  %1113 = vmatpush.bf16.msrb.mxu0 %v1551_v25  ;;  %1570 = vmatpush.bf16.msra.mxu2 %v1551_v25 }
 0x15f   : > { %v544_v22 = vadd.f32 %v543_v20, %v1935_v11  ;;  %v648_v20 = vmax.f32 %v495_v10, 0.0 }
 0x161   : > { %v617_v24 = vmax.f32 %v544_v22, 0.0  ;;  %v2033_v53 = vpop.f32.mrf.mxu2  ;;  %v680_v61 = vpack.c.bf16 %v648_v20, %v646_v17 }
 0x162   : > { %v840_v57 = vadd.f32 %v2029_v48, %v2033_v53 }
 0x163   : > { %v665_v29 = vpack.c.bf16 %v617_v24, %v615_v23 }
 0x165   : > { %881 = vmatmul.bf16.gmra.mxu2 %v674_v27  ;;  %945 = vmatmul.bf16.gmra.mxu3 %v665_v29 }
 0x166   : > { %v546_v19 = vpop.f32.mrf.mxu1 }
 0x167   : > { %v547_v35 = vadd.f32 %v546_v19, %v1935_v11 }
 0x169   : > { %v619_v40 = vmax.f32 %v547_v35, 0.0  ;;  %v2041_v6 = vpop.f32.mrf.mxu2 }
 0x16e   : > { %v548_v36 = vpop.f32.mrf.mxu1 }
 0x16f   : > { %v549_v39 = vadd.f32 %v548_v36, %v1935_v11 }
 0x171   : > { %v621_v41 = vmax.f32 %v549_v39, 0.0  ;;  %v844_v16 = vpop.f32.mrf.mxu2 }
 0x172   : > { %v845_v45 = vadd.f32 %v2029_v48, %v844_v16 }
 0x173   : > { %v667_v43 = vpack.c.bf16 %v621_v41, %v619_v40 }
 0x175   : > { %886 = vmatmul.bf16.gmra.mxu2 %v676_v44  ;;  %950 = vmatmul.bf16.gmra.mxu3 %v667_v43 }
 0x176   : > { %v551_v46 = vpop.f32.mrf.mxu1 }
 0x177   : > { %v552_v54 = vadd.f32 %v551_v46, %v1935_v11 }
 0x178   : > { %v911_v47 = vpop.f32.mrf.mxu3 }
 0x179   : > { %v912_v59 = vadd.f32 %v911_v47, %v823_v32  ;;  %v623_v0 = vmax.f32 %v552_v54, 0.0  ;;  %v847_v33 = vpop.f32.mrf.mxu2  ;;  %v838_v54 = vadd.f32 %v2029_v48, %v2024_v42 }
 0x17b   : > { %v991_v3 = vmax.f32 %v912_v59, 0.0 }
 0x17e   : > { %v553_v56 = vpop.f32.mrf.mxu1 }
 0x17f   : > { %v554_v60 = vadd.f32 %v553_v56, %v1935_v11 }
 0x180   : > { %v913_v63 = vpop.f32.mrf.mxu3 }
 0x181   : > { %v625_v1 = vmax.f32 %v554_v60, 0.0  ;;  %v914_v28 = vadd.f32 %v913_v63, %v825_v55  ;;  %v849_v50 = vpop.f32.mrf.mxu2 }
 0x183   : > { %v669_v13 = vpack.c.bf16 %v625_v1, %v623_v0  ;;  %v992_v4 = vmax.f32 %v914_v28, 0.0 }
 0x185   : > { %891 = vmatmul.bf16.gmra.mxu2 %v678_v5  ;;  %955 = vmatmul.bf16.gmra.mxu3 %v669_v13  ;;  %v1023_v26 = vpack.c.bf16 %v992_v4, %v991_v3 }
 0x186   : > { %v556_v51 = vpop.f32.mrf.mxu1 }
 0x187   : > { %1114 = vmatmul.bf16.vlgmr.msrb.gmra.mxu0 %v1023_v26  ;;  %v557_v15 = vadd.f32 %v556_v51, %v1935_v11  ;;  %v843_v51 = vadd.f32 %v2029_v48, %v2041_v6 }
 0x188   : > { %v916_v49 = vpop.f32.mrf.mxu3 }
 0x189   : > { %v917_v2 = vadd.f32 %v916_v49, %v828_v12  ;;  %v627_v23 = vmax.f32 %v557_v15, 0.0  ;;  %v852_v55 = vpop.f32.mrf.mxu2 }
 0x18b   : > { %v993_v31 = vmax.f32 %v917_v2, 0.0 }
 0x18e   : > { %v558_v14 = vpop.f32.mrf.mxu1 }
 0x18f   : > { %v559_v62 = vadd.f32 %v558_v14, %v1935_v11 }
 0x190   : > { %v918_v22 = vpop.f32.mrf.mxu3 }
 0x191   : > { %v629_v24 = vmax.f32 %v559_v62, 0.0  ;;  %v919_v25 = vadd.f32 %v918_v22, %v830_v7  ;;  %v854_v5 = vpop.f32.mrf.mxu2 }
 0x193   : > { %v671_v27 = vpack.c.bf16 %v629_v24, %v627_v23  ;;  %v994_v29 = vmax.f32 %v919_v25, 0.0 }
 0x195   : > { %896 = vmatmul.bf16.gmra.mxu2 %v680_v61  ;;  %960 = vmatmul.bf16.gmra.mxu3 %v671_v27  ;;  %v1024_v21 = vpack.c.bf16 %v994_v29, %v993_v31  ;;  %v848_v31 = vadd.f32 %v2029_v48, %v847_v33  ;;  %v850_v29 = vadd.f32 %v2029_v48, %v849_v50 }
 0x196   : > { %v561_v19 = vpop.f32.mrf.mxu1 }
 0x197   : > { %1119 = vmatmul.bf16.gmra.mxu0 %v1024_v21  ;;  %v562_v35 = vadd.f32 %v561_v19, %v1935_v11 }
 0x198   : > { %v921_v8 = vpop.f32.mrf.mxu3 }
 0x199   : > { %v922_v38 = vadd.f32 %v921_v8, %v833_v34  ;;  %v631_v40 = vmax.f32 %v562_v35, 0.0  ;;  %v857_v20 = vpop.f32.mrf.mxu2 }
 0x19b   : > { %v995_v44 = vmax.f32 %v922_v38, 0.0 }
 0x19e   : > { %v563_v36 = vpop.f32.mrf.mxu1 }
 0x19f   : > { %v564_v39 = vadd.f32 %v563_v36, %v1935_v11 }
 0x1a0   : > { %v923_v9 = vpop.f32.mrf.mxu3 }
 0x1a1   : > { %v633_v41 = vmax.f32 %v564_v39, 0.0  ;;  %v924_v43 = vadd.f32 %v923_v9, %v835_v37  ;;  %v859_v25 = vpop.f32.mrf.mxu2 }
 0x1a3   : > { %v673_v46 = vpack.c.bf16 %v633_v41, %v631_v40  ;;  %v996_v47 = vmax.f32 %v924_v43, 0.0  ;;  %v853_v41 = vadd.f32 %v2029_v48, %v852_v55 }
 0x1a5   : > { %965 = vmatmul.bf16.gmra.mxu3 %v673_v46  ;;  %v1025_v52 = vpack.c.bf16 %v996_v47, %v995_v44  ;;  %v855_v46 = vadd.f32 %v2029_v48, %v854_v5 }
 0x1a6   : > { %v566_v18 = vpop.f32.mrf.mxu1 }
 0x1a7   : > { %1124 = vmatmul.bf16.gmra.mxu0 %v1025_v52  ;;  %v567_v30 = vadd.f32 %v566_v18, %v1935_v11 }
 0x1a8   : > { %v926_v32 = vpop.f32.mrf.mxu3 }
 0x1a9   : > { %v927_v58 = vadd.f32 %v926_v32, %v838_v54  ;;  %v635_v63 = vmax.f32 %v567_v30, 0.0  ;;  %v862_v9 = vpop.f32.mrf.mxu2 }
 0x1ab   : > { %v997_v28 = vmax.f32 %v927_v58, 0.0 }
 0x1ae   : > { %v568_v56 = vpop.f32.mrf.mxu1 }
 0x1af   : > { %v569_v59 = vadd.f32 %v568_v56, %v1935_v11 }
 0x1b0   : > { %v928_v60 = vpop.f32.mrf.mxu3 }
 0x1b1   : > { %v637_v0 = vmax.f32 %v569_v59, 0.0  ;;  %v929_v1 = vadd.f32 %v928_v60, %v840_v57  ;;  %v864_v52 = vpop.f32.mrf.mxu2 }
 0x1b3   : > { %v675_v3 = vpack.c.bf16 %v637_v0, %v635_v63  ;;  %v998_v13 = vmax.f32 %v929_v1, 0.0  ;;  %v858_v63 = vadd.f32 %v2029_v48, %v857_v20  ;;  %v860_v0 = vadd.f32 %v2029_v48, %v859_v25 }
 0x1b5   : > { %970 = vmatmul.bf16.gmra.mxu3 %v675_v3  ;;  %v1026_v4 = vpack.c.bf16 %v998_v13, %v997_v28 }
 0x1b6   : > { %v571_v42 = vpop.f32.mrf.mxu1 }
 0x1b7   : > { %1129 = vmatmul.bf16.gmra.mxu0 %v1026_v4  ;;  %v572_v53 = vadd.f32 %v571_v42, %v1935_v11 }
 0x1b8   : > { %v931_v26 = vpop.f32.mrf.mxu3 }
 0x1b9   : > { %v932_v10 = vadd.f32 %v931_v26, %v843_v51  ;;  %v639_v7 = vmax.f32 %v572_v53, 0.0  ;;  %v867_v60 = vpop.f32.mrf.mxu2  ;;  %v863_v26 = vadd.f32 %v2029_v48, %v862_v9  ;;  %v865_v53 = vadd.f32 %v2029_v48, %v864_v52 }
 0x1bb   : > { %v999_v2 = vmax.f32 %v932_v10, 0.0 }
 0x1be   : > { %v573_v49 = vpop.f32.mrf.mxu1 }
 0x1bf   : > { %v574_v12 = vadd.f32 %v573_v49, %v1935_v11 }
 0x1c0   : > { %v933_v15 = vpop.f32.mrf.mxu3 }
 0x1c1   : > { %v641_v14 = vmax.f32 %v574_v12, 0.0  ;;  %v934_v17 = vadd.f32 %v933_v15, %v845_v45  ;;  %v869_v4 = vpop.f32.mrf.mxu2  ;;  %v2086_v12 = vld [vmem:[%s2206_s4 + $0x3] ss:$0 sm:$0xff] }
 0x1c3   : > { %v677_v62 = vpack.c.bf16 %v641_v14, %v639_v7  ;;  %v1000_v22 = vmax.f32 %v934_v17, 0.0 }
 0x1c5   : > { %975 = vmatmul.bf16.gmra.mxu3 %v677_v62  ;;  %v1027_v23 = vpack.c.bf16 %v1000_v22, %v999_v2 }
 0x1c6   : > { %v576_v24 = vpop.f32.mrf.mxu1 }
 0x1c7   : > { %1134 = vmatmul.bf16.gmra.mxu0 %v1027_v23  ;;  %v577_v16 = vadd.f32 %v576_v24, %v1935_v11  ;;  %v868_v23 = vadd.f32 %v2029_v48, %v867_v60 }
 0x1c8   : > { %v936_v6 = vpop.f32.mrf.mxu3 }
 0x1c9   : > { %v937_v61 = vadd.f32 %v936_v6, %v848_v31  ;;  %v643_v8 = vmax.f32 %v577_v16, 0.0  ;;  %v872_v51 = vpop.f32.mrf.mxu2  ;;  %v870_v6 = vadd.f32 %v2029_v48, %v869_v4 }
 0x1cb   : > { %v1001_v36 = vmax.f32 %v937_v61, 0.0 }
 0x1ce   : > { %v578_v27 = vpop.f32.mrf.mxu1 }
 0x1cf   : > { %v579_v21 = vadd.f32 %v578_v27, %v1935_v11 }
 0x1d0   : > { %v938_v19 = vpop.f32.mrf.mxu3 }
 0x1d1   : > { %v645_v34 = vmax.f32 %v579_v21, 0.0  ;;  %v939_v35 = vadd.f32 %v938_v19, %v850_v29  ;;  %v874_v2 = vpop.f32.mrf.mxu2 }
 0x1d3   : > { %v679_v37 = vpack.c.bf16 %v645_v34, %v643_v8  ;;  %v1002_v38 = vmax.f32 %v939_v35, 0.0 }
 0x1d5   : > { %980 = vmatmul.bf16.gmra.mxu3 %v679_v37  ;;  %v1028_v39 = vpack.c.bf16 %v1002_v38, %v1001_v36  ;;  %v873_v37 = vadd.f32 %v2029_v48, %v872_v51 }
 0x1d6   : > { %v581_v40 = vpop.f32.mrf.mxu1 }
 0x1d7   : > { %1139 = vmatmul.bf16.gmra.mxu0 %v1028_v39  ;;  %v582_v43 = vadd.f32 %v581_v40, %v1935_v11  ;;  %v875_v39 = vadd.f32 %v2029_v48, %v874_v2 }
 0x1d8   : > { %v941_v33 = vpop.f32.mrf.mxu3 }
 0x1d9   : > { %v942_v47 = vadd.f32 %v941_v33, %v853_v41  ;;  %v647_v32 = vmax.f32 %v582_v43, 0.0  ;;  %v877_v27 = vpop.f32.mrf.mxu2 }
 0x1db   : > { %v1003_v56 = vmax.f32 %v942_v47, 0.0 }
 0x1de   : > { %v583_v44 = vpop.f32.mrf.mxu1 }
 0x1df   : > { %v584_v50 = vadd.f32 %v583_v44, %v1935_v11 }
 0x1e0   : > { %v943_v18 = vpop.f32.mrf.mxu3 }
 0x1e1   : > { %v649_v54 = vmax.f32 %v584_v50, 0.0  ;;  %v944_v30 = vadd.f32 %v943_v18, %v855_v46  ;;  %v879_v35 = vpop.f32.mrf.mxu2 }
 0x1e3   : > { %v681_v57 = vpack.c.bf16 %v649_v54, %v647_v32  ;;  %v1004_v58 = vmax.f32 %v944_v30, 0.0  ;;  %v878_v32 = vadd.f32 %v2029_v48, %v877_v27  ;;  %v880_v30 = vadd.f32 %v2029_v48, %v879_v35 }
 0x1e5   : > { %985 = vmatmul.bf16.gmra.mxu3 %v681_v57  ;;  %v1029_v59 = vpack.c.bf16 %v1004_v58, %v1003_v56 }
 0x1e7   : > { %1144 = vmatmul.bf16.gmra.mxu0 %v1029_v59 }
 0x1e8   : > { %v946_v55 = vpop.f32.mrf.mxu3 }
 0x1e9   : > { %v947_v1 = vadd.f32 %v946_v55, %v858_v63  ;;  %v882_v50 = vpop.f32.mrf.mxu2 }
 0x1eb   : > { %v1005_v3 = vmax.f32 %v947_v1, 0.0 }
 0x1f0   : > { %v948_v11 = vpop.f32.mrf.mxu3 }
 0x1f1   : > { %v949_v28 = vadd.f32 %v948_v11, %v860_v0  ;;  %v884_v57 = vpop.f32.mrf.mxu2 }
 0x1f3   : > { %v1006_v13 = vmax.f32 %v949_v28, 0.0 }
 0x1f5   : > { %v1030_v42 = vpack.c.bf16 %v1006_v13, %v1005_v3  ;;  %v883_v13 = vadd.f32 %v2029_v48, %v882_v50 }
 0x1f7   : > { %1149 = vmatmul.bf16.gmra.mxu0 %v1030_v42  ;;  %v885_v42 = vadd.f32 %v2029_v48, %v884_v57 }
 0x1f8   : > { %v951_v5 = vpop.f32.mrf.mxu3 }
 0x1f9   : > { %v952_v49 = vadd.f32 %v951_v5, %v863_v26  ;;  %v887_v28 = vpop.f32.mrf.mxu2 }
 0x1fb   : > { %v1007_v15 = vmax.f32 %v952_v49, 0.0 }
 0x200   : > { %v953_v45 = vpop.f32.mrf.mxu3 }
 0x201   : > { %v954_v10 = vadd.f32 %v953_v45, %v865_v53  ;;  %v889_v45 = vpop.f32.mrf.mxu2 }
 0x203   : > { %v1008_v7 = vmax.f32 %v954_v10, 0.0 }
 0x204   : > { %v1115_v14 = vpop.f32.mrf.mxu0 }
 0x205   : > { %v1031_v17 = vpack.c.bf16 %v1008_v7, %v1007_v15  ;;  %v1116_v20 = vadd.f32 %v2086_v12, %v1115_v14 }
 0x207   : > { %1195 = vst [vmem:[%s2089_s11] sm:$0xff] %v1116_v20  ;;  %1154 = vmatmul.bf16.gmra.mxu0 %v1031_v17  ;;  %v888_v20 = vadd.f32 %v2029_v48, %v887_v28 }
 0x208   : > { %v956_v62 = vpop.f32.mrf.mxu3 }
 0x209   : > { %v957_v25 = vadd.f32 %v956_v62, %v868_v23  ;;  %v892_v62 = vpop.f32.mrf.mxu2 }
 0x20b   : > { %v1009_v29 = vmax.f32 %v957_v25, 0.0 }
 0x20c   : > { %v1117_v22 = vpop.f32.mrf.mxu0 }
 0x20d   : > { %v1118_v24 = vadd.f32 %v2086_v12, %v1117_v22  ;;  %v890_v22 = vadd.f32 %v2029_v48, %v889_v45 }
 0x20f   : > { %1196 = vst [vmem:[%s2089_s11 + $0x8] sm:$0xff] %v1118_v24 }
 0x210   : > { %v958_v31 = vpop.f32.mrf.mxu3 }
 0x211   : > { %v959_v16 = vadd.f32 %v958_v31, %v870_v6 }
 0x213   : > { %v1010_v61 = vmax.f32 %v959_v16, 0.0 }
 0x214   : > { %v1120_v21 = vpop.f32.mrf.mxu0 }
 0x215   : > { %v1032_v19 = vpack.c.bf16 %v1010_v61, %v1009_v29  ;;  %v1121_v8 = vadd.f32 %v2086_v12, %v1120_v21  ;;  %v894_v61 = vpop.f32.mrf.mxu2 }
 0x216   : > { %v895_v35 = vadd.f32 %v2029_v48, %v894_v61 }
 0x217   : > { %1197 = vst [vmem:[%s2089_s11 + $0x10] sm:$0xff] %v1121_v8  ;;  %1159 = vmatmul.bf16.gmra.mxu0 %v1032_v19  ;;  %v893_v8 = vadd.f32 %v2029_v48, %v892_v62 }
 0x218   : > { %v961_v34 = vpop.f32.mrf.mxu3 }
 0x219   : > { %v962_v9 = vadd.f32 %v961_v34, %v873_v37 }
 0x21b   : > { %v1011_v41 = vmax.f32 %v962_v9, 0.0 }
 0x21c   : > { %v1122_v36 = vpop.f32.mrf.mxu0 }
 0x21d   : > { %v1123_v38 = vadd.f32 %v2086_v12, %v1122_v36 }
 0x21f   : > { %1198 = vst [vmem:[%s2089_s11 + $0x18] sm:$0xff] %v1123_v38 }
 0x220   : > { %v963_v40 = vpop.f32.mrf.mxu3 }
 0x221   : > { %v964_v33 = vadd.f32 %v963_v40, %v875_v39  ;;  %v897_v39 = vpop.f32.mrf.mxu2 }
 0x222   : > { %v898_v50 = vadd.f32 %v2029_v48, %v897_v39 }
 0x223   : > { %v1012_v43 = vmax.f32 %v964_v33, 0.0 }
 0x224   : > { %v1125_v44 = vpop.f32.mrf.mxu0 }
 0x225   : > { %v1033_v46 = vpack.c.bf16 %v1012_v43, %v1011_v41  ;;  %v1126_v47 = vadd.f32 %v2086_v12, %v1125_v44 }
 0x227   : > { %1199 = vst [vmem:[%s2089_s11 + $0x20] sm:$0xff] %v1126_v47  ;;  %1164 = vmatmul.bf16.gmra.mxu0 %v1033_v46 }
 0x228   : > { %v966_v52 = vpop.f32.mrf.mxu3 }
 0x229   : > { %v967_v56 = vadd.f32 %v966_v52, %v878_v32  ;;  %v899_v46 = vpop.f32.mrf.mxu2 }
 0x22b   : > { %v1013_v55 = vmax.f32 %v967_v56, 0.0 }
 0x22c   : > { %v1127_v18 = vpop.f32.mrf.mxu0 }
 0x22d   : > { %v1128_v54 = vadd.f32 %v2086_v12, %v1127_v18  ;;  %v900_v18 = vadd.f32 %v2029_v48, %v899_v46 }
 0x22f   : > { %1200 = vst [vmem:[%s2089_s11 + $0x28] sm:$0xff] %v1128_v54 }
 0x230   : > { %v968_v58 = vpop.f32.mrf.mxu3 }
 0x231   : > { %v969_v59 = vadd.f32 %v968_v58, %v880_v30 }
 0x233   : > { %v1014_v60 = vmax.f32 %v969_v59, 0.0 }
 0x234   : > { %v1130_v63 = vpop.f32.mrf.mxu0 }
 0x235   : > { %v1034_v0 = vpack.c.bf16 %v1014_v60, %v1013_v55  ;;  %v1131_v1 = vadd.f32 %v2086_v12, %v1130_v63 }
 0x237   : > { %1201 = vst [vmem:[%s2089_s11 + $0x30] sm:$0xff] %v1131_v1  ;;  %1169 = vmatmul.bf16.gmra.mxu0 %v1034_v0 }
 0x238   : > { %v971_v11 = vpop.f32.mrf.mxu3 }
 0x239   : > { %v972_v5 = vadd.f32 %v971_v11, %v883_v13 }
 0x23b   : > { %v1015_v53 = vmax.f32 %v972_v5, 0.0 }
 0x23c   : > { %v1132_v3 = vpop.f32.mrf.mxu0 }
 0x23d   : > { %v1133_v4 = vadd.f32 %v2086_v12, %v1132_v3 }
 0x23f   : > { %1202 = vst [vmem:[%s2089_s11 + $0x38] sm:$0xff] %v1133_v4 }
 0x240   : > { %v973_v26 = vpop.f32.mrf.mxu3 }
 0x241   : > { %v974_v51 = vadd.f32 %v973_v26, %v885_v42 }
 0x243   : > { %v1016_v49 = vmax.f32 %v974_v51, 0.0 }
 0x244   : > { %v1135_v10 = vpop.f32.mrf.mxu0 }
 0x245   : > { %v1035_v15 = vpack.c.bf16 %v1016_v49, %v1015_v53  ;;  %v1136_v7 = vadd.f32 %v2086_v12, %v1135_v10 }
 0x247   : > { %1203 = vst [vmem:[%s2089_s11 + $0x40] sm:$0xff] %v1136_v7  ;;  %1174 = vmatmul.bf16.gmra.mxu0 %v1035_v15 }
 0x248   : > { %v976_v14 = vpop.f32.mrf.mxu3 }
 0x249   : > { %v977_v23 = vadd.f32 %v976_v14, %v888_v20 }
 0x24b   : > { %v1017_v25 = vmax.f32 %v977_v23, 0.0 }
 0x24c   : > { %v1137_v17 = vpop.f32.mrf.mxu0 }
 0x24d   : > { %v1138_v2 = vadd.f32 %v2086_v12, %v1137_v17 }
 0x24f   : > { %1204 = vst [vmem:[%s2089_s11 + $0x48] sm:$0xff] %v1138_v2 }
 0x250   : > { %v978_v24 = vpop.f32.mrf.mxu3 }
 0x251   : > { %v979_v6 = vadd.f32 %v978_v24, %v890_v22 }
 0x253   : > { %v1018_v31 = vmax.f32 %v979_v6, 0.0 }
 0x254   : > { %v1140_v16 = vpop.f32.mrf.mxu0 }
 0x255   : > { %v1036_v27 = vpack.c.bf16 %v1018_v31, %v1017_v25  ;;  %v1141_v29 = vadd.f32 %v2086_v12, %v1140_v16 }
 0x257   : > { %1205 = vst [vmem:[%s2089_s11 + $0x50] sm:$0xff] %v1141_v29  ;;  %1179 = vmatmul.bf16.gmra.mxu0 %v1036_v27 }
 0x258   : > { %v981_v21 = vpop.f32.mrf.mxu3 }
 0x259   : > { %v982_v36 = vadd.f32 %v981_v21, %v893_v8 }
 0x25b   : > { %v1019_v9 = vmax.f32 %v982_v36, 0.0 }
 0x25c   : > { %v1142_v19 = vpop.f32.mrf.mxu0 }
 0x25d   : > { %v1143_v34 = vadd.f32 %v2086_v12, %v1142_v19 }
 0x25f   : > { %1206 = vst [vmem:[%s2089_s11 + $0x58] sm:$0xff] %v1143_v34 }
 0x260   : > { %v983_v37 = vpop.f32.mrf.mxu3 }
 0x261   : > { %v984_v38 = vadd.f32 %v983_v37, %v895_v35 }
 0x263   : > { %v1020_v40 = vmax.f32 %v984_v38, 0.0 }
 0x264   : > { %v1145_v33 = vpop.f32.mrf.mxu0 }
 0x265   : > { %v1037_v41 = vpack.c.bf16 %v1020_v40, %v1019_v9  ;;  %v1146_v43 = vadd.f32 %v2086_v12, %v1145_v33 }
 0x267   : > { %1207 = vst [vmem:[%s2089_s11 + $0x60] sm:$0xff] %v1146_v43  ;;  %1184 = vmatmul.bf16.gmra.mxu0 %v1037_v41 }
 0x268   : > { %v986_v44 = vpop.f32.mrf.mxu3 }
 0x269   : > { %v987_v32 = vadd.f32 %v986_v44, %v898_v50 }
 0x26b   : > { %v1021_v56 = vmax.f32 %v987_v32, 0.0 }
 0x26c   : > { %v1147_v47 = vpop.f32.mrf.mxu0 }
 0x26d   : > { %v1148_v52 = vadd.f32 %v2086_v12, %v1147_v47 }
 0x26f   : > { %1208 = vst [vmem:[%s2089_s11 + $0x68] sm:$0xff] %v1148_v52 }
 0x270   : > { %v988_v54 = vpop.f32.mrf.mxu3 }
 0x271   : > { %v989_v30 = vadd.f32 %v988_v54, %v900_v18 }
 0x273   : > { %v1022_v57 = vmax.f32 %v989_v30, 0.0 }
 0x274   : > { %v1150_v58 = vpop.f32.mrf.mxu0 }
 0x275   : > { %v1038_v59 = vpack.c.bf16 %v1022_v57, %v1021_v56  ;;  %v1151_v55 = vadd.f32 %v2086_v12, %v1150_v58 }
 0x277   : > { %1209 = vst [vmem:[%s2089_s11 + $0x70] sm:$0xff] %v1151_v55  ;;  %1189 = vmatmul.bf16.vlgmr.msra.gmra.mxu2 %v1038_v59 }
 0x27c   : > { %v1152_v60 = vpop.f32.mrf.mxu0 }
 0x27d   : > { %v1153_v63 = vadd.f32 %v2086_v12, %v1152_v60 }
 0x27f   : > { %1210 = vst [vmem:[%s2089_s11 + $0x78] sm:$0xff] %v1153_v63 }
 0x284   : > { %v1155_v48 = vpop.f32.mrf.mxu0 }
 0x285   : > { %v1156_v0 = vadd.f32 %v2086_v12, %v1155_v48 }
 0x287   : > { %1211 = vst [vmem:[%s2089_s11 + $0x80] sm:$0xff] %v1156_v0 }
 0x28c   : > { %v1157_v1 = vpop.f32.mrf.mxu0 }
 0x28d   : > { %v1158_v11 = vadd.f32 %v2086_v12, %v1157_v1 }
 0x28f   : > { %1212 = vst [vmem:[%s2089_s11 + $0x88] sm:$0xff] %v1158_v11 }
 0x294   : > { %v1160_v28 = vpop.f32.mrf.mxu0 }
 0x295   : > { %v1161_v3 = vadd.f32 %v2086_v12, %v1160_v28 }
 0x297   : > { %1213 = vst [vmem:[%s2089_s11 + $0x90] sm:$0xff] %v1161_v3 }
 0x29c   : > { %v1162_v13 = vpop.f32.mrf.mxu0 }
 0x29d   : > { %v1163_v4 = vadd.f32 %v2086_v12, %v1162_v13 }
 0x29f   : > { %1214 = vst [vmem:[%s2089_s11 + $0x98] sm:$0xff] %v1163_v4 }
 0x2a4   : > { %v1165_v42 = vpop.f32.mrf.mxu0 }
 0x2a5   : > { %v1166_v5 = vadd.f32 %v2086_v12, %v1165_v42 }
 0x2a7   : > { %1215 = vst [vmem:[%s2089_s11 + $0xa0] sm:$0xff] %v1166_v5 }
 0x2ac   : > { %v1167_v26 = vpop.f32.mrf.mxu0 }
 0x2ad   : > { %v1168_v51 = vadd.f32 %v2086_v12, %v1167_v26 }
 0x2af   : > { %1216 = vst [vmem:[%s2089_s11 + $0xa8] sm:$0xff] %v1168_v51 }
 0x2b4   : > { %v1170_v53 = vpop.f32.mrf.mxu0 }
 0x2b5   : > { %v1171_v49 = vadd.f32 %v2086_v12, %v1170_v53 }
 0x2b7   : > { %1217 = vst [vmem:[%s2089_s11 + $0xb0] sm:$0xff] %v1171_v49 }
 0x2bc   : > { %v1172_v45 = vpop.f32.mrf.mxu0 }
 0x2bd   : > { %v1173_v10 = vadd.f32 %v2086_v12, %v1172_v45 }
 0x2bf   : > { %1218 = vst [vmem:[%s2089_s11 + $0xb8] sm:$0xff] %v1173_v10 }
 0x2c4   : > { %v1175_v15 = vpop.f32.mrf.mxu0 }
 0x2c5   : > { %v1176_v7 = vadd.f32 %v2086_v12, %v1175_v15 }
 0x2c7   : > { %1219 = vst [vmem:[%s2089_s11 + $0xc0] sm:$0xff] %v1176_v7 }
 0x2cc   : > { %v1177_v14 = vpop.f32.mrf.mxu0 }
 0x2cd   : > { %v1178_v17 = vadd.f32 %v2086_v12, %v1177_v14 }
 0x2cf   : > { %1220 = vst [vmem:[%s2089_s11 + $0xc8] sm:$0xff] %v1178_v17 }
 0x2d4   : > { %v1180_v20 = vpop.f32.mrf.mxu0 }
 0x2d5   : > { %v1181_v2 = vadd.f32 %v2086_v12, %v1180_v20 }
 0x2d7   : > { %1221 = vst [vmem:[%s2089_s11 + $0xd0] sm:$0xff] %v1181_v2 }
 0x2dc   : > { %v1182_v62 = vpop.f32.mrf.mxu0 }
 0x2dd   : > { %v1183_v22 = vadd.f32 %v2086_v12, %v1182_v62 }
 0x2df   : > { %1222 = vst [vmem:[%s2089_s11 + $0xd8] sm:$0xff] %v1183_v22 }
 0x2e4   : > { %v1185_v23 = vpop.f32.mrf.mxu0 }
 0x2e5   : > { %v1186_v24 = vadd.f32 %v2086_v12, %v1185_v23 }
 0x2e7   : > { %1223 = vst [vmem:[%s2089_s11 + $0xe0] sm:$0xff] %v1186_v24 }
 0x2ec   : > { %v1187_v6 = vpop.f32.mrf.mxu0 }
 0x2ed   : > { %v1188_v25 = vadd.f32 %v2086_v12, %v1187_v6 }
 0x2ef   : > { %1224 = vst [vmem:[%s2089_s11 + $0xe8] sm:$0xff] %v1188_v25 }
 0x2fa   : > { %v1190_v31 = vpop.f32.mrf.mxu2 }
 0x2fb   : > { %v1191_v16 = vadd.f32 %v2086_v12, %v1190_v31 }
 0x2fd   : > { %1225 = vst [vmem:[%s2089_s11 + $0xf0] sm:$0xff] %v1191_v16 }
 0x302   : > { %v1192_v27 = vpop.f32.mrf.mxu2 }
 0x303   : > { %v1193_v29 = vadd.f32 %v2086_v12, %v1192_v27 }
 0x305   : > { %1226 = vst [vmem:[%s2089_s11 + $0xf8] sm:$0xff] %v1193_v29 }
 0x306   : > { %1641 = shalt.err (!%p1638_p3)
}
 0x307   : > { %s1678_s7 = smov 128   ;;  %s1679_s10 = smov 8  }
 0x308   : > { %1571 = dma.vmem_to_hbm [thread:$0]  (%p1748_p5), %s1241_s16, 4096, %s1243_s17, %s1228_s23, %s1678_s7, %s1678_s7, %s1679_s10  }
 0x309 PF: > { %p1577_p4 = scmp.ge.s32.totalorder %s1676_s21, 2  ;;  %s1257_s11 = sand.u32 1, %s1664_s18  }
 0x30a   : > { %s1258_s12 = scalar_lea.sflag [#allocation3], %s1257_s11 }
 0x30b   : > { %p1574_p7 = pnand %p1577_p4, %p1752_p6 }
 0x30d   : > { %p1575_p8 = pneg %p1574_p7 }
 0x30f   : > { %1659 = dma.done.wait (%p1575_p8), %s1258_s12, 4096  }
 0x310   : > { %1661 = vsyncadd (%p1575_p8), %s1258_s12, 4294963200  ;;  %p15_p9 = scmp.ge.s32.totalorder %s1735_s24, 4   ;;  %s2210_s18 = smov %s1668_s19 }
 0x311   : > { %s2211_s19 = smov %s1672_s20  ;;  %s2212_s20 = smov %s1746_s27 }
 0x312   : > { %s2213_s21 = smov %s1735_s24  ;;  %17 = sbr.rel (!%p15_p9) target bundleno = 3 (0x3), region = 75 }
 0x317   :  { %1264 = vsyncpa [#allocation3], 1 }
 0x318   :  { %1266 = vsyncpa [#allocation3 + $0x1], 1 }

</bundles_post_ra>
